<compile_context>
chip_gen: v7x
topology: tpu7x:2x2x1
jax: 0.10.0
libtpu: 0.0.40
codegen_flags: <defaults>
</compile_context>

<pallas_src>
import math
from typing import NamedTuple, Union

import jax
import jax.numpy as jnp
from jax.experimental import pallas as pl
from jax.experimental.pallas import tpu as pltpu

RP = 128                       # lane-dense padding of the LoRA rank dimension
VMEM_LIMIT = 48 * 1024 * 1024  # explicit scoped-VMEM limit (safe on v5e/v6e/v7x)


def _round_up(x, m):
    return ((x + m - 1) // m) * m


# --------------------------------- kernels ---------------------------------

def _lora_linear_kernel(x_ref, w_ref, a_ref, bup_ref, bias_ref, o_ref,
                        acc_ref, down_ref):
    # x_ref:    (tm, tk)      activation tile (compute dtype)
    # w_ref:    (tk, tn)      W^T tile
    # a_ref:    (K_pad, RP)   full lora_down^T, resident in VMEM
    # bup_ref:  (RP, tn)      lora_up^T tile, pre-scaled by multiplier*scale
    # bias_ref: (1, tn)       original Linear bias tile (f32)
    # o_ref:    (tm, tn)      output tile
    # acc_ref:  (tm, tn) f32  base accumulator (resident across k)
    # down_ref: (tm, RP) f32  x @ A^T for the current M-tile (computed at j==0)
    j = pl.program_id(1)
    k = pl.program_id(2)
    nk = pl.num_programs(2)
    tk = x_ref.shape[1]

    # Base path: accumulate x @ W^T in f32; fold the bias into the k==0 init.
    part = jnp.dot(x_ref[...], w_ref[...], preferred_element_type=jnp.float32)

    @pl.when(k == 0)
    def _init():
        acc_ref[...] = part + bias_ref[...]

    @pl.when(k > 0)
    def _accum():
        acc_ref[...] += part

    # Down projection: computed once per M-tile (only at j == 0), accumulated
    # over k, and reused by all j > 0 of the same i.
    @pl.when(j == 0)
    def _down():
        start = pl.multiple_of(k * tk, tk)
        a_blk = a_ref[pl.ds(start, tk), :]
        dp = jnp.dot(x_ref[...], a_blk, preferred_element_type=jnp.float32)

        @pl.when(k == 0)
        def _():
            down_ref[...] = dp

        @pl.when(k > 0)
        def _():
            down_ref[...] += dp

    @pl.when(k == nk - 1)
    def _epilogue():
        up = jnp.dot(down_ref[...].astype(bup_ref.dtype), bup_ref[...],
                     preferred_element_type=jnp.float32)   # scale folded into B'
        o_ref[...] = (acc_ref[...] + up).astype(o_ref.dtype)


def _linear_bias_kernel(x_ref, w_ref, bias_ref, o_ref, acc_ref):
    # Merged path: y = x @ W'^T + bias, with W' = W + scale * B @ A.
    k = pl.program_id(2)
    nk = pl.num_programs(2)
    part = jnp.dot(x_ref[...], w_ref[...], preferred_element_type=jnp.float32)

    @pl.when(k == 0)
    def _():
        acc_ref[...] = part + bias_ref[...]

    @pl.when(k > 0)
    def _():
        acc_ref[...] += part

    @pl.when(k == nk - 1)
    def _():
        o_ref[...] = acc_ref[...].astype(o_ref.dtype)


# ---------------------- one-time weight preparation ------------------------

class LoRALinearWeights(NamedTuple):
    w_t: jax.Array     # (K_pad, N_pad) W^T, compute dtype
    a_t: jax.Array     # (K_pad, RP)    lora_down^T (rank lane-padded)
    b_up: jax.Array    # (RP, N_pad)    lora_up^T, pre-scaled
    bias: jax.Array    # (1, N_pad)     f32
    in_dim: int
    out_dim: int
    tn: int
    tk: int


class MergedLinearWeights(NamedTuple):
    w_t: jax.Array     # (K_pad, N_pad) (W + scale*B@A)^T, compute dtype
    bias: jax.Array    # (1, N_pad)     f32
    in_dim: int
    out_dim: int
    tn: int
    tk: int


def prepare_lora_weights(w, bias, lora_down_w, lora_up_w, *,
                         multiplier=1.0, alpha=1.0, lora_dim=None,
                         tn=None, tk=None, compute_dtype=jnp.bfloat16,
                         merge=False):
    """Hoisted one-time weight prep (LoRA weights are frozen at inference).

    w: (out, in), bias: (out,), lora_down_w: (rank, in), lora_up_w: (out, rank).
    If merge=True the (static) LoRA delta is folded into W and the kernel
    becomes a plain matmul + bias.  NOTE: multiplier/alpha are baked in either
    way; runtime changes to multiplier require re-running this prep.
    """
    out_dim, in_dim = w.shape
    rank = lora_down_w.shape[0]
    if lora_dim is None:
        lora_dim = rank
    scale_mult = float(multiplier) * (float(alpha) / float(lora_dim))

    if tn is None:
        tn = min(512, _round_up(out_dim, 128))    # keep >= 256 on v6e/v7x when possible
    if tk is None:
        tk = min(2048, _round_up(in_dim, 128))    # big K tiles -> fewer grid steps
    nn = pl.cdiv(out_dim, tn)
    nk = pl.cdiv(in_dim, tk)
    N_pad, K_pad = nn * tn, nk * tk

    bias2d = jnp.pad(bias.astype(jnp.float32).reshape(1, out_dim),
                     ((0, 0), (0, N_pad - out_dim)))            # (1, N_pad)

    if merge:
        w_merged = (w.astype(jnp.float32)
                    + scale_mult * (lora_up_w.astype(jnp.float32)
                                    @ lora_down_w.astype(jnp.float32)))
        w_t = jnp.pad(jnp.transpose(w_merged).astype(compute_dtype),
                      ((0, K_pad - in_dim), (0, N_pad - out_dim)))
        return MergedLinearWeights(w_t=w_t, bias=bias2d, in_dim=in_dim,
                                   out_dim=out_dim, tn=tn, tk=tk)

    w_t = jnp.pad(jnp.transpose(w).astype(compute_dtype),
                  ((0, K_pad - in_dim), (0, N_pad - out_dim)))   # (K_pad, N_pad)
    a_t = jnp.pad(jnp.transpose(lora_down_w).astype(compute_dtype),
                  ((0, K_pad - in_dim), (0, RP - rank)))         # (K_pad, RP)
    b_up = jnp.pad((jnp.transpose(lora_up_w) * scale_mult).astype(compute_dtype),
                   ((0, RP - rank), (0, N_pad - out_dim)))       # (RP, N_pad)

    return LoRALinearWeights(w_t=w_t, a_t=a_t, b_up=b_up, bias=bias2d,
                             in_dim=in_dim, out_dim=out_dim, tn=tn, tk=tk)


# ------------------------------- forward -----------------------------------

def lora_linear_forward(x, weights: Union[LoRALinearWeights, MergedLinearWeights],
                        *, tm=None, out_dtype=None):
    """x: (batch, seq, in_dim) -> (batch, seq, out_dim)."""
    B, S, K = x.shape
    assert K == weights.in_dim, "input feature dim mismatch"
    N = weights.out_dim
    tn, tk = weights.tn, weights.tk
    N_pad = weights.bias.shape[1]
    K_pad = weights.w_t.shape[0]
    nn = N_pad // tn
    nk = K_pad // tk

    M = B * S
    if tm is None:
        tm = min(512, _round_up(M, 8))
    nm = pl.cdiv(M, tm)
    M_pad = nm * tm

    cdt = weights.w_t.dtype
    if out_dtype is None:
        out_dtype = cdt          # bf16 output by default: halves HBM writeback
    x2d = jnp.pad(x.reshape(M, K).astype(cdt),
                  ((0, M_pad - M), (0, K_pad - K)))

    out_bytes = M_pad * N_pad * jnp.dtype(out_dtype).itemsize

    if isinstance(weights, MergedLinearWeights):
        flops = 2 * M_pad * K_pad * N_pad
        bytes_accessed = (x2d.size * x2d.dtype.itemsize
                          + weights.w_t.size * weights.w_t.dtype.itemsize
                          + weights.bias.size * 4 + out_bytes)
        out2d = pl.pallas_call(
            _linear_bias_kernel,
            out_shape=jax.ShapeDtypeStruct((M_pad, N_pad), out_dtype),
            grid=(nm, nn, nk),
            in_specs=[
                pl.BlockSpec((tm, tk), lambda i, j, k: (i, k)),       # x tile
                pl.BlockSpec((tk, tn), lambda i, j, k: (k, j)),       # merged W'^T
                pl.BlockSpec((1, tn), lambda i, j, k: (0, j)),        # bias
            ],
            out_specs=pl.BlockSpec((tm, tn), lambda i, j, k: (i, j)),
            scratch_shapes=[pltpu.VMEM((tm, tn), jnp.float32)],
            compiler_params=pltpu.CompilerParams(
                dimension_semantics=("parallel", "parallel", "arbitrary"),
                vmem_limit_bytes=VMEM_LIMIT),
            cost_estimate=pl.CostEstimate(flops=flops, transcendentals=0,
                                          bytes_accessed=bytes_accessed),
        )(x2d, weights.w_t, weights.bias)
    else:
        flops = (2 * M_pad * K_pad * N_pad       # base matmul
                 + 2 * M_pad * K_pad * RP        # down projection (once per M-tile)
                 + 2 * M_pad * RP * N_pad)       # up projection
        bytes_accessed = (x2d.size * x2d.dtype.itemsize
                          + weights.w_t.size * weights.w_t.dtype.itemsize
                          + weights.a_t.size * weights.a_t.dtype.itemsize
                          + weights.b_up.size * weights.b_up.dtype.itemsize
                          + weights.bias.size * 4 + out_bytes)
        out2d = pl.pallas_call(
            _lora_linear_kernel,
            out_shape=jax.ShapeDtypeStruct((M_pad, N_pad), out_dtype),
            grid=(nm, nn, nk),
            in_specs=[
                pl.BlockSpec((tm, tk), lambda i, j, k: (i, k)),       # x tile
                pl.BlockSpec((tk, tn), lambda i, j, k: (k, j)),       # W^T tile
                pl.BlockSpec((K_pad, RP), lambda i, j, k: (0, 0)),    # full A^T (VMEM-resident)
                pl.BlockSpec((RP, tn), lambda i, j, k: (0, j)),       # scaled lora_up^T
                pl.BlockSpec((1, tn), lambda i, j, k: (0, j)),        # bias
            ],
            out_specs=pl.BlockSpec((tm, tn), lambda i, j, k: (i, j)),
            scratch_shapes=[pltpu.VMEM((tm, tn), jnp.float32),        # base acc
                            pltpu.VMEM((tm, RP), jnp.float32)],       # x @ A^T
            compiler_params=pltpu.CompilerParams(
                # j/k carry scratch dependencies (down_ref produced at j==0,
                # consumed at j>0; acc/down accumulate over k) -> "arbitrary".
                dimension_semantics=("parallel", "arbitrary", "arbitrary"),
                vmem_limit_bytes=VMEM_LIMIT),
            cost_estimate=pl.CostEstimate(flops=flops, transcendentals=0,
                                          bytes_accessed=bytes_accessed),
        )(x2d, weights.w_t, weights.a_t, weights.b_up, weights.bias)

    return out2d[:M, :N].reshape(B, S, N)


# -------------- deterministic parameter init (synthetic weights) -----------

def init_params(key, in_dim, out_dim, lora_dim):
    k_w, k_b, k_down, k_ortho = jax.random.split(key, 4)

    # org Linear: default PyTorch init (uniform +- 1/sqrt(in_dim)), with bias.
    bound_w = 1.0 / math.sqrt(in_dim)
    w = jax.random.uniform(k_w, (out_dim, in_dim), jnp.float32, -bound_w, bound_w)
    bias = jax.random.uniform(k_b, (out_dim,), jnp.float32, -bound_w, bound_w)

    # lora_down: kaiming_uniform_(a=1) -> bound = sqrt(3 / fan_in)
    bound_d = math.sqrt(3.0 / in_dim)
    lora_down_w = jax.random.uniform(k_down, (lora_dim, in_dim), jnp.float32,
                                     -bound_d, bound_d)

    # lora_up: init_ortho_proj -> columns of a random orthogonal basis
    # (deterministic in-script stand-in for load_ortho_dict's SVD checkpoint).
    g = jax.random.normal(k_ortho, (out_dim, out_dim), jnp.float32)
    q, _ = jnp.linalg.qr(g)
    lora_up_w = q[:, :lora_dim]  # (out_dim, lora_dim)

    return w, bias, lora_down_w, lora_up_w


def reference_forward(x, w, bias, lora_down_w, lora_up_w, multiplier, alpha, lora_dim):
    scale = alpha / lora_dim
    org = jnp.einsum('bsk,nk->bsn', x, w) + bias
    down = jnp.einsum('bsk,rk->bsr', x, lora_down_w)
    up = jnp.einsum('bsr,nr->bsn', down, lora_up_w)
    return org + up * multiplier * scale


if __name__ == "__main__":
    MULTIPLIER, ALPHA = 1.0, 1.0

    # --- toy shape matching the module defaults ---
    B, S, IN_DIM, OUT_DIM, LORA_DIM = 2, 8, 32, 32, 4
    key = jax.random.PRNGKey(0)
    k_x, k_p = jax.random.split(key)
    x = jax.random.normal(k_x, (B, S, IN_DIM), jnp.float32)
    w, bias, a_w, b_w = init_params(k_p, IN_DIM, OUT_DIM, LORA_DIM)
    ref = reference_forward(x, w, bias, a_w, b_w, MULTIPLIER, ALPHA, LORA_DIM)

    # Split LoRA path, bf16 compute + bf16 output (production default).
    wt_bf16 = prepare_lora_weights(w, bias, a_w, b_w, multiplier=MULTIPLIER,
                                   alpha=ALPHA, lora_dim=LORA_DIM,
                                   compute_dtype=jnp.bfloat16)
    out = jax.block_until_ready(lora_linear_forward(x, wt_bf16))
    assert out.shape == (B, S, OUT_DIM)
    assert jnp.allclose(out.astype(jnp.float32), ref, atol=2e-2, rtol=2e-2), \
        "bf16 split path mismatch"

    # Split LoRA path, f32 compute.
    wt_f32 = prepare_lora_weights(w, bias, a_w, b_w, multiplier=MULTIPLIER,
                                  alpha=ALPHA, lora_dim=LORA_DIM,
                                  compute_dtype=jnp.float32)
    out32 = jax.block_until_ready(lora_linear_forward(x, wt_f32))
    assert jnp.allclose(out32, ref, atol=2e-2, rtol=2e-2), "f32 split path mismatch"

    # Fully-merged path (static multiplier/alpha folded into W').
    wt_m = prepare_lora_weights(w, bias, a_w, b_w, multiplier=MULTIPLIER,
                                alpha=ALPHA, lora_dim=LORA_DIM,
                                compute_dtype=jnp.float32, merge=True)
    outm = jax.block_until_ready(lora_linear_forward(x, wt_m))
    assert jnp.allclose(outm, ref, atol=2e-2, rtol=2e-2), "merged path mismatch"

    # Multi-tile config with non-divisible dims: nm=3, nn=3, nk=2 exercises
    # per-i accumulator re-init, K-accumulation, and the reuse of the j==0
    # down-projection scratch by j>0 tiles.
    B2, S2, IN2, OUT2, R2 = 2, 24, 160, 288, 4
    k_x2, k_p2 = jax.random.split(jax.random.PRNGKey(1))
    x2 = jax.random.normal(k_x2, (B2, S2, IN2), jnp.float32)
    w2, bias2, a2, b2 = init_params(k_p2, IN2, OUT2, R2)
    ref2 = reference_forward(x2, w2, bias2, a2, b2, MULTIPLIER, ALPHA, R2)
    wt2 = prepare_lora_weights(w2, bias2, a2, b2, multiplier=MULTIPLIER,
                               alpha=ALPHA, lora_dim=R2, tn=128, tk=128,
                               compute_dtype=jnp.float32)
    out2 = jax.block_until_ready(
        lora_linear_forward(x2, wt2, tm=16, out_dtype=jnp.float32))
    assert out2.shape == (B2, S2, OUT2)
    assert jnp.allclose(out2, ref2, atol=2e-2, rtol=2e-2), "tiled split path mismatch"

    print("KERNEL_OK")
</pallas_src>

<mosaic_0001>
module attributes {stable_mosaic.version = 11 : i64} {
  func.func @_lora_linear_kernel(%arg0: i32, %arg1: i32, %arg2: i32, %arg3: memref<16x128xbf16, #tpu.memory_space<vmem>>, %arg4: memref<128x128xbf16, #tpu.memory_space<vmem>>, %arg5: memref<128x128xbf16, #tpu.memory_space<vmem>>, %arg6: memref<128x128xbf16, #tpu.memory_space<vmem>>, %arg7: memref<1x128xf32, #tpu.memory_space<vmem>>, %arg8: memref<16x128xbf16, #tpu.memory_space<vmem>>, %arg9: memref<16x128xf32, #tpu.memory_space<vmem>>, %arg10: memref<16x128xf32, #tpu.memory_space<vmem>>) attributes {dimension_semantics = [#tpu.dimension_semantics<parallel>, #tpu.dimension_semantics<arbitrary>, #tpu.dimension_semantics<arbitrary>], iteration_bounds = array<i64: 1, 1, 1>, scalar_prefetch = 0 : i64, scratch_operands = 2 : i64, tpu.core_type = #tpu.core_type<tc>, window_params = [{transform_indices = @transform_0, window_bounds = array<i64: 16, 128>}, {transform_indices = @transform_1, window_bounds = array<i64: 128, 128>}, {pipeline_mode = #tpu.pipeline_mode<synchronous>, transform_indices = @transform_2, window_bounds = array<i64: 128, 128>}, {transform_indices = @transform_3, window_bounds = array<i64: 128, 128>}, {transform_indices = @transform_4, window_bounds = array<i64: 1, 128>}, {transform_indices = @transform_5, window_bounds = array<i64: 16, 128>}]} {
    %c0 = arith.constant 0 : index
    %c0_0 = arith.constant 0 : index
    %0 = vector.load %arg3[%c0, %c0_0] : memref<16x128xbf16, #tpu.memory_space<vmem>>, vector<16x128xbf16>
    %c0_1 = arith.constant 0 : index
    %c0_2 = arith.constant 0 : index
    %1 = vector.load %arg4[%c0_1, %c0_2] : memref<128x128xbf16, #tpu.memory_space<vmem>>, vector<128x128xbf16>
    %cst = arith.constant dense<0.000000e+00> : vector<16x128xf32>
    %2 = tpu.matmul %0, %1, %cst {dimension_numbers = #tpu.dot_dimension_numbers<[1], [0], [0], [1], [0, 0, 1, 1], [], []>} : vector<16x128xbf16>, vector<128x128xbf16>, vector<16x128xf32> -> vector<16x128xf32>
    %c0_i32 = arith.constant 0 : i32
    %3 = arith.cmpi eq, %arg2, %c0_i32 : i32
    %4 = arith.extui %3 : i1 to i32
    %c0_i32_3 = arith.constant 0 : i32
    %5 = arith.cmpi ne, %4, %c0_i32_3 : i32
    scf.if %5 {
      %c0_10 = arith.constant 0 : index
      %c0_11 = arith.constant 0 : index
      %15 = vector.load %arg7[%c0_10, %c0_11] : memref<1x128xf32, #tpu.memory_space<vmem>>, vector<1x128xf32>
      %16 = vector.broadcast %15 : vector<1x128xf32> to vector<16x128xf32>
      %17 = arith.addf %2, %16 : vector<16x128xf32>
      %c0_12 = arith.constant 0 : index
      %c0_13 = arith.constant 0 : index
      %18 = vector.load %arg9[%c0_12, %c0_13] : memref<16x128xf32, #tpu.memory_space<vmem>>, vector<16x128xf32>
      tpu.vector_store %arg9[%c0_12, %c0_13], %17 {strides = array<i32>} : memref<16x128xf32, #tpu.memory_space<vmem>>, vector<16x128xf32>,
    } else {
    }
    %c0_i32_4 = arith.constant 0 : i32
    %6 = arith.cmpi sgt, %arg2, %c0_i32_4 : i32
    %7 = arith.extui %6 : i1 to i32
    %c0_i32_5 = arith.constant 0 : i32
    %8 = arith.cmpi ne, %7, %c0_i32_5 : i32
    scf.if %8 {
      %c0_10 = arith.constant 0 : index
      %c0_11 = arith.constant 0 : index
      %15 = vector.load %arg9[%c0_10, %c0_11] : memref<16x128xf32, #tpu.memory_space<vmem>>, vector<16x128xf32>
      %16 = arith.addf %15, %2 : vector<16x128xf32>
      %c0_12 = arith.constant 0 : index
      %c0_13 = arith.constant 0 : index
      %17 = vector.load %arg9[%c0_12, %c0_13] : memref<16x128xf32, #tpu.memory_space<vmem>>, vector<16x128xf32>
      tpu.vector_store %arg9[%c0_12, %c0_13], %16 {strides = array<i32>} : memref<16x128xf32, #tpu.memory_space<vmem>>, vector<16x128xf32>,
    } else {
    }
    %c0_i32_6 = arith.constant 0 : i32
    %9 = arith.cmpi eq, %arg1, %c0_i32_6 : i32
    %10 = arith.extui %9 : i1 to i32
    %c0_i32_7 = arith.constant 0 : i32
    %11 = arith.cmpi ne, %10, %c0_i32_7 : i32
    scf.if %11 {
      %c128_i32 = arith.constant 128 : i32
      %15 = arith.muli %arg2, %c128_i32 : i32
      %16 = tpu.assume_multiple %15, 128 : i32
      %17 = arith.index_cast %16 : i32 to index
      %c0_10 = arith.constant 0 : index
      %18 = vector.load %arg5[%17, %c0_10] : memref<128x128xbf16, #tpu.memory_space<vmem>>, vector<128x128xbf16>
      %c0_11 = arith.constant 0 : index
      %c0_12 = arith.constant 0 : index
      %19 = vector.load %arg3[%c0_11, %c0_12] : memref<16x128xbf16, #tpu.memory_space<vmem>>, vector<16x128xbf16>
      %cst_13 = arith.constant dense<0.000000e+00> : vector<16x128xf32>
      %20 = tpu.matmul %19, %18, %cst_13 {dimension_numbers = #tpu.dot_dimension_numbers<[1], [0], [0], [1], [0, 0, 1, 1], [], []>} : vector<16x128xbf16>, vector<128x128xbf16>, vector<16x128xf32> -> vector<16x128xf32>
      %c0_i32_14 = arith.constant 0 : i32
      %21 = arith.cmpi eq, %arg2, %c0_i32_14 : i32
      %22 = arith.extui %21 : i1 to i32
      %c0_i32_15 = arith.constant 0 : i32
      %23 = arith.cmpi ne, %22, %c0_i32_15 : i32
      scf.if %23 {
        %c0_18 = arith.constant 0 : index
        %c0_19 = arith.constant 0 : index
        %27 = vector.load %arg10[%c0_18, %c0_19] : memref<16x128xf32, #tpu.memory_space<vmem>>, vector<16x128xf32>
        tpu.vector_store %arg10[%c0_18, %c0_19], %20 {strides = array<i32>} : memref<16x128xf32, #tpu.memory_space<vmem>>, vector<16x128xf32>,
      } else {
      }
      %c0_i32_16 = arith.constant 0 : i32
      %24 = arith.cmpi sgt, %arg2, %c0_i32_16 : i32
      %25 = arith.extui %24 : i1 to i32
      %c0_i32_17 = arith.constant 0 : i32
      %26 = arith.cmpi ne, %25, %c0_i32_17 : i32
      scf.if %26 {
        %c0_18 = arith.constant 0 : index
        %c0_19 = arith.constant 0 : index
        %27 = vector.load %arg10[%c0_18, %c0_19] : memref<16x128xf32, #tpu.memory_space<vmem>>, vector<16x128xf32>
        %28 = arith.addf %27, %20 : vector<16x128xf32>
        %c0_20 = arith.constant 0 : index
        %c0_21 = arith.constant 0 : index
        %29 = vector.load %arg10[%c0_20, %c0_21] : memref<16x128xf32, #tpu.memory_space<vmem>>, vector<16x128xf32>
        tpu.vector_store %arg10[%c0_20, %c0_21], %28 {strides = array<i32>} : memref<16x128xf32, #tpu.memory_space<vmem>>, vector<16x128xf32>,
      } else {
      }
    } else {
    }
    %c0_i32_8 = arith.constant 0 : i32
    %12 = arith.cmpi eq, %arg2, %c0_i32_8 : i32
    %13 = arith.extui %12 : i1 to i32
    %c0_i32_9 = arith.constant 0 : i32
    %14 = arith.cmpi ne, %13, %c0_i32_9 : i32
    scf.if %14 {
      %c0_10 = arith.constant 0 : index
      %c0_11 = arith.constant 0 : index
      %15 = vector.load %arg10[%c0_10, %c0_11] : memref<16x128xf32, #tpu.memory_space<vmem>>, vector<16x128xf32>
      %16 = arith.truncf %15 : vector<16x128xf32> to vector<16x128xbf16>
      %c0_12 = arith.constant 0 : index
      %c0_13 = arith.constant 0 : index
      %17 = vector.load %arg6[%c0_12, %c0_13] : memref<128x128xbf16, #tpu.memory_space<vmem>>, vector<128x128xbf16>
      %cst_14 = arith.constant dense<0.000000e+00> : vector<16x128xf32>
      %18 = tpu.matmul %16, %17, %cst_14 {dimension_numbers = #tpu.dot_dimension_numbers<[1], [0], [0], [1], [0, 0, 1, 1], [], []>} : vector<16x128xbf16>, vector<128x128xbf16>, vector<16x128xf32> -> vector<16x128xf32>
      %c0_15 = arith.constant 0 : index
      %c0_16 = arith.constant 0 : index
      %19 = vector.load %arg9[%c0_15, %c0_16] : memref<16x128xf32, #tpu.memory_space<vmem>>, vector<16x128xf32>
      %20 = arith.addf %19, %18 : vector<16x128xf32>
      %21 = arith.truncf %20 : vector<16x128xf32> to vector<16x128xbf16>
      %c0_17 = arith.constant 0 : index
      %c0_18 = arith.constant 0 : index
      %22 = vector.load %arg8[%c0_17, %c0_18] : memref<16x128xbf16, #tpu.memory_space<vmem>>, vector<16x128xbf16>
      tpu.vector_store %arg8[%c0_17, %c0_18], %21 {strides = array<i32>} : memref<16x128xbf16, #tpu.memory_space<vmem>>, vector<16x128xbf16>,
    } else {
    }
    return
  }
  func.func @transform_0(%arg0: i32, %arg1: i32, %arg2: i32) -> (i32, i32) {
    %c0_i32 = arith.constant 0 : i32
    return %arg0, %arg2 : i32, i32
  }
  func.func @transform_1(%arg0: i32, %arg1: i32, %arg2: i32) -> (i32, i32) {
    %c0_i32 = arith.constant 0 : i32
    return %arg2, %arg1 : i32, i32
  }
  func.func @transform_2(%arg0: i32, %arg1: i32, %arg2: i32) -> (i32, i32) {
    %c0_i32 = arith.constant 0 : i32
    %c0_i32_0 = arith.constant 0 : i32
    %c0_i32_1 = arith.constant 0 : i32
    return %c0_i32, %c0_i32_0 : i32, i32
  }
  func.func @transform_3(%arg0: i32, %arg1: i32, %arg2: i32) -> (i32, i32) {
    %c0_i32 = arith.constant 0 : i32
    %c0_i32_0 = arith.constant 0 : i32
    return %c0_i32, %arg1 : i32, i32
  }
  func.func @transform_4(%arg0: i32, %arg1: i32, %arg2: i32) -> (i32, i32) {
    %c0_i32 = arith.constant 0 : i32
    %c0_i32_0 = arith.constant 0 : i32
    return %c0_i32, %arg1 : i32, i32
  }
  func.func @transform_5(%arg0: i32, %arg1: i32, %arg2: i32) -> (i32, i32) {
    %c0_i32 = arith.constant 0 : i32
    return %arg0, %arg1 : i32, i32
  }
}

</mosaic_0001>

<bundles_post_ra>
// kernel: tpu_custom_call.1
= control target key start
LH: loop header
LB: loop body
LE: loop exit
PB: predicated region body
PF: predicated region fallthrough
CT: control target
= control target key end

     0   :  { %10 = vsyncpa [#allocation5], 0  ;;  %s940_s0 = inlined_call_operand.hbm [shape: bf16[16,128], index: 0, kind: input, shape index: {}]   ;;  %s941_s1 = inlined_call_operand.hbm [shape: bf16[128,128], index: 1, kind: input, shape index: {}]   ;;  %s942_s2 = inlined_call_operand.hbm [shape: bf16[128,128], index: 2, kind: input, shape index: {}]   ;;  %s943_s3 = inlined_call_operand.hbm [shape: bf16[128,128], index: 3, kind: input, shape index: {}]   ;;  %s944_s4 = inlined_call_operand.vmem [shape: f32[1,128], index: 4, kind: input, shape index: {}]   ;;  %s945_s5 = inlined_call_operand.hbm [shape: bf16[16,128], index: 5, kind: output, shape index: {}]  }
   0x1   :  { %11 = vsyncpa [#allocation8], 0 }
   0x2   :  { %12 = vsyncpa [#allocation11], 0 }
   0x3   :  { %13 = vsyncpa [#allocation6], 0  ;;  %s779_s18 = smov [#allocation7]   ;;  %s780_s20 = smov [#allocation4]  }
   0x4   :  { %s31_s19 = sshll.u32 %s779_s18, 4  ;;  %s19_s21 = sshll.u32 %s780_s20, 4  ;;  %s32_s19 = int_to_ptr.vmem [resolvable:$true] %s31_s19  ;;  %s818_s21 = int_to_ptr.vmem [resolvable:$true] %s19_s21 }
   0x5   :  { %s661_s24 = scalar_lea.hbm %s941_s1, 1024 }
   0x6   :  { %p662_p0 = scmp.ne.s32.totalorder %s941_s1, %s661_s24  ;;  %p665_p1 = scmp.lt.u32.totalorder %s661_s24, %s941_s1 }
   0x8   :  { %p667_p2 = pnand %p665_p1, %p662_p0 }
   0xa   :  { %670 = shalt.err (!%p667_p2)
}
   0xb   :  { %s671_s29 = scalar_lea.vmem %s32_s19, 1024  ;;  %p676_p4 = scmp.lt.s32.totalorder %s32_s19, %s32_s19 }
   0xc   :  { %p672_p3 = scmp.ne.s32.totalorder %s32_s19, %s671_s29  ;;  %p677_p5 = scmp.lt.s32.totalorder %s671_s29, %s671_s29 }
   0xe   :  { %p678_p6 = por %p677_p5, %p676_p4 }
  0x10   :  { %p679_p7 = pnand %p678_p6, %p672_p3 }
  0x12   :  { %682 = shalt.err (!%p679_p7)
}
  0x13   :  { %s781_s30 = smov 64   ;;  %s782_s6 = smov 4  }
  0x14   :  { %37 = dma.hbm_to_vmem [thread:$0]  %s941_s1, 1024, %s32_s19, [#allocation8], %s781_s30, %s781_s30, %s782_s6  }
  0x15   :  { %s683_s11 = scalar_lea.hbm %s940_s0, 128 }
  0x16   :  { %p684_p8 = scmp.ne.s32.totalorder %s940_s0, %s683_s11  ;;  %p687_p9 = scmp.lt.u32.totalorder %s683_s11, %s940_s0 }
  0x18   :  { %p689_p10 = pnand %p687_p9, %p684_p8 }
  0x1a   :  { %692 = shalt.err (!%p689_p10)
}
  0x1b   :  { %s693_s16 = scalar_lea.vmem %s818_s21, 128  ;;  %p698_p12 = scmp.lt.s32.totalorder %s818_s21, %s818_s21 }
  0x1c   :  { %p694_p11 = scmp.ne.s32.totalorder %s818_s21, %s693_s16  ;;  %p699_p13 = scmp.lt.s32.totalorder %s693_s16, %s693_s16 }
  0x1e   :  { %p700_p0 = por %p699_p13, %p698_p12 }
  0x20   :  { %p701_p1 = pnand %p700_p0, %p694_p11 }
  0x22   :  { %704 = shalt.err (!%p701_p1)
}
  0x23   :  { %25 = dma.hbm_to_vmem [thread:$0]  %s940_s0, 128, %s818_s21, [#allocation5], %s781_s30, %s781_s30, %s782_s6  }
  0x24   :  { %s783_s18 = smov [#allocation9]   ;;  %s784_s20 = smov [#allocation10]  }
  0x25   :  { %s43_s19 = sshll.u32 %s783_s18, 4  ;;  %s55_s22 = sshll.u32 %s784_s20, 4  ;;  %s44_s19 = int_to_ptr.vmem [resolvable:$true] %s43_s19  ;;  %s855_s22 = int_to_ptr.vmem [resolvable:$true] %s55_s22 }
  0x26   :  { %s705_s25 = scalar_lea.hbm %s942_s2, 1024 }
  0x27   :  { %p706_p2 = scmp.ne.s32.totalorder %s942_s2, %s705_s25  ;;  %p709_p3 = scmp.lt.u32.totalorder %s705_s25, %s942_s2 }
  0x29   :  { %p711_p4 = pnand %p709_p3, %p706_p2 }
  0x2b   :  { %714 = shalt.err (!%p711_p4)
}
  0x2c   :  { %s715_s0 = scalar_lea.vmem %s44_s19, 1024  ;;  %p720_p6 = scmp.lt.s32.totalorder %s44_s19, %s44_s19 }
  0x2d   :  { %p716_p5 = scmp.ne.s32.totalorder %s44_s19, %s715_s0  ;;  %p721_p7 = scmp.lt.s32.totalorder %s715_s0, %s715_s0 }
  0x2f   :  { %p722_p8 = por %p721_p7, %p720_p6 }
  0x31   :  { %p723_p9 = pnand %p722_p8, %p716_p5 }
  0x33   :  { %726 = shalt.err (!%p723_p9)
}
  0x34   :  { %49 = dma.hbm_to_vmem [thread:$0]  %s942_s2, 1024, %s44_s19, [#allocation8], %s781_s30, %s781_s30, %s782_s6  }
  0x35   :  { %s727_s10 = scalar_lea.hbm %s943_s3, 1024 }
  0x36   :  { %p728_p10 = scmp.ne.s32.totalorder %s943_s3, %s727_s10  ;;  %p731_p11 = scmp.lt.u32.totalorder %s727_s10, %s943_s3 }
  0x38   :  { %p733_p12 = pnand %p731_p11, %p728_p10 }
  0x3a   :  { %736 = shalt.err (!%p733_p12)
}
  0x3b   :  { %s737_s15 = scalar_lea.vmem %s855_s22, 1024  ;;  %p742_p0 = scmp.lt.s32.totalorder %s855_s22, %s855_s22 }
  0x3c   :  { %p738_p13 = scmp.ne.s32.totalorder %s855_s22, %s737_s15  ;;  %p743_p1 = scmp.lt.s32.totalorder %s737_s15, %s737_s15 }
  0x3e   :  { %p744_p2 = por %p743_p1, %p742_p0 }
  0x40   :  { %p745_p3 = pnand %p744_p2, %p738_p13 }
  0x42   :  { %748 = shalt.err (!%p745_p3)
}
  0x43   :  { %61 = dma.hbm_to_vmem [thread:$0]  %s943_s3, 1024, %s855_s22, [#allocation11], %s781_s30, %s781_s30, %s782_s6  }
  0x44   :  { %771 = dma.done.wait [#allocation5], 128  }
  0x45   :  { %772 = vsyncadd [#allocation5], 4294967168 }
  0x46   :  { %773 = dma.done.wait [#allocation8], 2048  }
  0x47   :  { %774 = vsyncadd [#allocation8], 4294965248 }
  0x48   :  { %775 = dma.done.wait [#allocation11], 1024  }
  0x49   :  { %776 = vsyncadd [#allocation11], 4294966272  ;;  %v785_v0 = vmov 0.0   ;;  %vm786_vm0 = vmmov 0   ;;  %v635_v1 = vld [vmem:[#allocation9] sm:$0xff]   ;;  %v636_v2 = vld [vmem:[#allocation9 + $0x8] sm:$0xff]  }
  0x4a   :  { %580 = vmatprep.subr.bf16.mxu1 %v785_v0  ;;  %596 = vmatprep.mubr.msk.bf16.mxu1 %vm786_vm0, %v785_v0  ;;  %v637_v3 = vld [vmem:[#allocation9 + $0x10] sm:$0xff]   ;;  %v644_v4 = vld [vmem:[#allocation7] sm:$0xff]   ;;  %v638_v5 = vld [vmem:[#allocation9 + $0x18] sm:$0xff]   ;;  %s787_s17 = smov [#allocation12]  }
  0x4b   :  { %560 = vmatprep.subr.bf16.mxu0 %v785_v0  ;;  %576 = vmatprep.mubr.msk.bf16.mxu0 %vm786_vm0, %v785_v0  ;;  %v645_v6 = vld [vmem:[#allocation7 + $0x8] sm:$0xff]   ;;  %v639_v7 = vld [vmem:[#allocation9 + $0x20] sm:$0xff]   ;;  %v646_v8 = vld [vmem:[#allocation7 + $0x10] sm:$0xff]   ;;  %s481_s18 = sshll.u32 %s787_s17, 4  ;;  %s482_s18 = int_to_ptr.vmem [resolvable:$true] %s481_s18 }
  0x4c   :  { %581 = vmatpush3.bf16.msra.mxu1 %v635_v1  ;;  %561 = vmatpush3.bf16.msra.mxu0 %v644_v4  ;;  %v640_v9 = vld [vmem:[#allocation9 + $0x28] sm:$0xff]   ;;  %v647_v10 = vld [vmem:[#allocation7 + $0x18] sm:$0xff]   ;;  %v641_v11 = vld [vmem:[#allocation9 + $0x30] sm:$0xff]   ;;  %s749_s19 = scalar_lea.vmem %s482_s18, 128  ;;  %p754_p5 = scmp.lt.s32.totalorder %s482_s18, %s482_s18 }
  0x4d   :  { %582 = vmatprep.subr.bf16.mxu1 %v785_v0  ;;  %562 = vmatprep.subr.bf16.mxu0 %v785_v0  ;;  %v648_v12 = vld [vmem:[#allocation7 + $0x20] sm:$0xff]   ;;  %v642_v13 = vld [vmem:[#allocation9 + $0x38] sm:$0xff]   ;;  %v649_v14 = vld [vmem:[#allocation7 + $0x28] sm:$0xff]   ;;  %p750_p4 = scmp.ne.s32.totalorder %s482_s18, %s749_s19  ;;  %p755_p6 = scmp.lt.s32.totalorder %s749_s19, %s749_s19 }
  0x4e   :  { %v643_v15 = vld [vmem:[#allocation4] sm:$0xff]   ;;  %v650_v16 = vld [vmem:[#allocation7 + $0x30] sm:$0xff]   ;;  %v653_v19 = vld [vmem:[#allocation10] sm:$0xff]  }
  0x4f   :  { %v651_v17 = vld [vmem:[#allocation7 + $0x38] sm:$0xff]   ;;  %v654_v20 = vld [vmem:[#allocation10 + $0x8] sm:$0xff]   ;;  %v655_v21 = vld [vmem:[#allocation10 + $0x10] sm:$0xff]   ;;  %p756_p7 = por %p755_p6, %p754_p5 }
  0x50   :  { %583 = vmatpush3.bf16.msra.mxu1 %v636_v2  ;;  %563 = vmatpush3.bf16.msra.mxu0 %v645_v6  ;;  %v652_v18 = vld [vmem:[#allocation4] sm:$0xff]   ;;  %v657_v23 = vld [vmem:[#allocation10 + $0x20] sm:$0xff]   ;;  %v658_v24 = vld [vmem:[#allocation10 + $0x28] sm:$0xff]  }
  0x51   :  { %584 = vmatprep.subr.bf16.mxu1 %v785_v0  ;;  %564 = vmatprep.subr.bf16.mxu0 %v785_v0  ;;  %v656_v22 = vld [vmem:[#allocation10 + $0x18] sm:$0xff]   ;;  %v659_v25 = vld [vmem:[#allocation10 + $0x30] sm:$0xff]   ;;  %p757_p8 = pnand %p756_p7, %p750_p4 }
  0x52   :  { %v660_v26 = vld [vmem:[#allocation10 + $0x38] sm:$0xff]  }
  0x53   :  { %v506_v32 = vld [vmem:[%s944_s4] ss:$0 sm:$0xff] }
  0x54   :  { %585 = vmatpush3.bf16.msra.mxu1 %v637_v3  ;;  %565 = vmatpush3.bf16.msra.mxu0 %v646_v8 }
  0x55   :  { %586 = vmatprep.subr.bf16.mxu1 %v785_v0  ;;  %566 = vmatprep.subr.bf16.mxu0 %v785_v0 }
  0x58   :  { %587 = vmatpush3.bf16.msra.mxu1 %v638_v5  ;;  %567 = vmatpush3.bf16.msra.mxu0 %v647_v10 }
  0x59   :  { %588 = vmatprep.subr.bf16.mxu1 %v785_v0  ;;  %568 = vmatprep.subr.bf16.mxu0 %v785_v0 }
  0x5c   :  { %589 = vmatpush3.bf16.msra.mxu1 %v639_v7  ;;  %569 = vmatpush3.bf16.msra.mxu0 %v648_v12 }
  0x5d   :  { %590 = vmatprep.subr.bf16.mxu1 %v785_v0  ;;  %570 = vmatprep.subr.bf16.mxu0 %v785_v0 }
  0x60   :  { %591 = vmatpush3.bf16.msra.mxu1 %v640_v9  ;;  %571 = vmatpush3.bf16.msra.mxu0 %v649_v14 }
  0x61   :  { %592 = vmatprep.subr.bf16.mxu1 %v785_v0  ;;  %572 = vmatprep.subr.bf16.mxu0 %v785_v0 }
  0x64   :  { %593 = vmatpush3.bf16.msra.mxu1 %v641_v11  ;;  %573 = vmatpush3.bf16.msra.mxu0 %v650_v16 }
  0x65   :  { %594 = vmatprep.subr.bf16.mxu1 %v785_v0  ;;  %574 = vmatprep.subr.bf16.mxu0 %v785_v0 }
  0x68   :  { %595 = vmatpush3.bf16.msra.mxu1 %v642_v13  ;;  %575 = vmatpush3.bf16.msra.mxu0 %v651_v17 }
  0x69   :  { %600 = vmatprep.subr.bf16.mxu0 %v785_v0 }
  0x6b   :  { %597 = vmatmul.mubr.bf16.vlgmr.msra.gmra.mrb[0].mxu1 %v643_v15  ;;  %577 = vmatmul.mubr.bf16.vlgmr.msra.gmra.mrb[0].mxu0 %v652_v18 }
  0x6c   :  { %601 = vmatpush3.bf16.msra.mxu0 %v653_v19  ;;  %616 = vmatprep.mubr.msk.bf16.mxu0 %vm786_vm0, %v785_v0 }
  0x6d   :  { %602 = vmatprep.subr.bf16.mxu0 %v785_v0 }
  0x70   :  { %603 = vmatpush3.bf16.msra.mxu0 %v654_v20 }
  0x71   :  { %604 = vmatprep.subr.bf16.mxu0 %v785_v0 }
  0x74   :  { %605 = vmatpush3.bf16.msra.mxu0 %v655_v21 }
  0x75   :  { %606 = vmatprep.subr.bf16.mxu0 %v785_v0 }
  0x78   :  { %607 = vmatpush3.bf16.msra.mxu0 %v656_v22 }
  0x79   :  { %608 = vmatprep.subr.bf16.mxu0 %v785_v0 }
  0x7c   :  { %609 = vmatpush3.bf16.msra.mxu0 %v657_v23 }
  0x7d   :  { %610 = vmatprep.subr.bf16.mxu0 %v785_v0 }
  0x80   :  { %611 = vmatpush3.bf16.msra.mxu0 %v658_v24 }
  0x81   :  { %612 = vmatprep.subr.bf16.mxu0 %v785_v0 }
  0x84   :  { %613 = vmatpush3.bf16.msra.mxu0 %v659_v25 }
  0x85   :  { %614 = vmatprep.subr.bf16.mxu0 %v785_v0 }
  0x88   :  { %615 = vmatpush3.bf16.msra.mxu0 %v660_v26 }
 0x13e   :  { %v330_v27 = vpop.f32.mrb[0].mxu1 }
 0x13f   :  { %v598_v28 = vpop.f32.mrb[1].mxu1 }
 0x140   :  { %v333_v29 = vpop.f32.mrb[2].mxu1 }
 0x141   :  { %v356_v30 = vpack.c.bf16 %v333_v29, %v330_v27  ;;  %v599_v31 = vpop.f32.mrb[3].mxu1 }
 0x143   :  { %617 = vmatmul.mubr.bf16.vlgmr.msra.gmra.mrb[0].mxu0 %v356_v30 }
 0x216   :  { %v455_v33 = vpop.f32.mrb[0].mxu0 }
 0x217   :  { %v618_v34 = vpop.f32.mrb[1].mxu0  ;;  %v620_v36 = vadd.f32 %v506_v32, %v455_v33 }
 0x218   :  { %v458_v35 = vpop.f32.mrb[2].mxu0 }
 0x219   :  { %v621_v37 = vadd.f32 %v506_v32, %v458_v35  ;;  %v619_v38 = vpop.f32.mrb[3].mxu0 }
 0x21b   :  { %v531_v39 = vpack.c.bf16 %v621_v37, %v620_v36 }
 0x21d   :  { %532 = vst [vmem:[#allocation12] sm:$0xff] %v531_v39  }
 0x21e   :  { %760 = shalt.err (!%p757_p8)
}
 0x21f   :  { %s761_s22 = scalar_lea.hbm %s945_s5, 128 }
 0x220   :  { %p762_p9 = scmp.ne.s32.totalorder %s945_s5, %s761_s22  ;;  %p765_p10 = scmp.lt.u32.totalorder %s761_s22, %s945_s5 }
 0x222   :  { %p767_p11 = pnand %p765_p10, %p762_p9 }
 0x224   :  { %770 = shalt.err (!%p767_p11)
}
 0x225   :  { %487 = dma.vmem_to_hbm [thread:$0]  %s482_s18, 128, %s945_s5, [#allocation6], %s781_s30, %s781_s30, %s782_s6  }
 0x226   :  { %777 = dma.done.wait [#allocation6], 128  }
 0x227   :  { %778 = vsyncadd [#allocation6], 4294967168 }
 0x228   :  { %491 = vsyncpa [#allocation5], 1 }
 0x229   :  { %492 = vsyncpa [#allocation8], 1 }
 0x22a   :  { %493 = vsyncpa [#allocation11], 1 }
 0x22b   :  { %494 = vsyncpa [#allocation6], 1 }

</bundles_post_ra>
